<compile_context>
chip_gen: v7x
topology: tpu7x:2x2x1
jax: 0.10.0
libtpu: 0.0.40
codegen_flags: <defaults>
</compile_context>

<pallas_src>
import functools

import jax
import jax.numpy as jnp
from jax.experimental import pallas as pl
from jax.experimental.pallas import tpu as pltpu


def _round_up(x, m):
    return (x + m - 1) // m * m


def _vmem_budget_bytes():
    # ~75% of physical VMEM; leaves headroom for compiler temporaries / double buffers.
    try:
        cap = int(pltpu.get_tpu_info().vmem_capacity_bytes)
    except Exception:
        cap = 64 * 1024 * 1024  # conservative fallback (v7x per-TC size)
    return max(16 * 1024 * 1024, (cap * 3) // 4)


# ---------------------------------------------------------------------------
# Fused forward kernel.
# grid = (2 passes, n_pad/tm row tiles); pass 0 = GCN layer 1 (+ row-wise layer-2
# projection), pass 1 = GCN layer 2 aggregation + JK concat + MLP + softmax.
# ---------------------------------------------------------------------------
def _fused_jk_kernel(
    x_ref,                                    # (n_pad, F_in) bf16, resident
    xw1_ref,                                  # (n_pad, Hp)   bf16, resident (X @ W1, precomputed)
    a_ref,                                    # A_hat: resident (n_pad, n_pad) OR pipelined (tm, n_pad)
    b1_ref, w2_ref, b2_ref,                   # GCN biases / layer-2 weight
    wm1x_ref, wm1h1_ref, wm1h2_ref, bm1_ref,  # MLP layer 1 (row-split weights), bias
    wm2_ref, bm2_ref,                         # MLP layer 2
    o_ref,                                    # (n_pad, Cp) f32, single resident output block
    h1_scr,                                   # (n_pad, Hp) bf16: relu(A (X W1) + b1)
    h1w2_scr,                                 # (n_pad, Hp) bf16: h1 @ W2
    *, tm, a_resident,
):
    p = pl.program_id(0)                      # 0: layer 1, 1: layer 2 + MLP + softmax
    t = pl.program_id(1)                      # row-tile index
    row0 = pl.multiple_of(t * tm, tm)

    if a_resident:
        a_tile = a_ref[pl.ds(row0, tm), :]    # resident A: slice this tile's rows from VMEM
    else:
        a_tile = a_ref[...]                   # pipelined A: current (tm, n_pad) block

    @pl.when(p == 0)
    def _():
        # GCN layer 1 for this row tile: h1 = relu(A_tile @ (X W1) + b1)
        agg = jnp.dot(a_tile, xw1_ref[...], preferred_element_type=jnp.float32)
        h1 = jnp.maximum(agg + b1_ref[...], 0.0).astype(jnp.bfloat16)
        h1_scr[pl.ds(row0, tm), :] = h1
        # Layer-2 projection is row-wise -> do this tile's rows now; pass 1 becomes
        # pure aggregation and no projection work is ever repeated.
        h1w2_scr[pl.ds(row0, tm), :] = jnp.dot(
            h1, w2_ref[...], preferred_element_type=jnp.float32
        ).astype(jnp.bfloat16)

    @pl.when(p == 1)
    def _():
        # GCN layer 2 for this row tile: h2 = relu(A_tile @ (h1 W2) + b2)
        agg = jnp.dot(a_tile, h1w2_scr[...], preferred_element_type=jnp.float32)
        h2 = jnp.maximum(agg + b2_ref[...], 0.0).astype(jnp.bfloat16)

        x0 = x_ref[pl.ds(row0, tm), :]        # (tm, F_in) bf16
        h1 = h1_scr[pl.ds(row0, tm), :]       # (tm, Hp)  bf16

        # Jumping-knowledge concat folded into partial matmuls against row-slices of
        # the first MLP weight (no [N, F_in + 2H] concat array is ever materialized).
        z = (jnp.dot(x0, wm1x_ref[...], preferred_element_type=jnp.float32)
             + jnp.dot(h1, wm1h1_ref[...], preferred_element_type=jnp.float32)
             + jnp.dot(h2, wm1h2_ref[...], preferred_element_type=jnp.float32)
             + bm1_ref[...])
        z = jnp.maximum(z, 0.0).astype(jnp.bfloat16)
        logits = (jnp.dot(z, wm2_ref[...], preferred_element_type=jnp.float32)
                  + bm2_ref[...])             # padded logit columns carry a -1e30 bias

        # Fused row softmax (dim=1); reciprocal runs on the EUP slot (nearly free).
        m = jnp.max(logits, axis=1, keepdims=True)
        e = jnp.exp(logits - m)
        probs = e * pl.reciprocal(jnp.sum(e, axis=1, keepdims=True), approx=True)
        o_ref[pl.ds(row0, tm), :] = probs     # lane-dense (Cp multiple of 128) store


# ---------------------------------------------------------------------------
# Jitted padded forward (all N^2 casting/padding already done in prepare_jk).
# ---------------------------------------------------------------------------
@functools.partial(jax.jit, static_argnames=("tm", "a_resident", "vmem_limit_bytes"))
def _forward_padded(x_pad, a_pad, w1, b1, w2, b2,
                    wm1x, wm1h1, wm1h2, bm1, wm2, bm2,
                    *, tm, a_resident, vmem_limit_bytes):
    n_pad, _ = x_pad.shape
    h_pad = w1.shape[1]
    c_pad = wm2.shape[1]
    n_tiles = n_pad // tm

    # Layer-1 projection hoisted OUT of the kernel (it was a serial bubble on the first
    # grid step with a weak MXU shape); one tiny extra N*Hp bf16 read instead.
    xw1 = jnp.dot(x_pad, w1, preferred_element_type=jnp.float32).astype(jnp.bfloat16)

    def _const(arr):
        # Whole array resident in VMEM; constant block index => DMA'd once, never refetched.
        return pl.BlockSpec(arr.shape, lambda p, t: (0, 0))

    if a_resident:
        a_spec = _const(a_pad)                                    # A_hat DMA'd once total
    else:
        a_spec = pl.BlockSpec((tm, n_pad), lambda p, t: (t, 0))   # pipelined row tiles

    kernel = functools.partial(_fused_jk_kernel, tm=tm, a_resident=a_resident)

    out = pl.pallas_call(
        kernel,
        out_shape=jax.ShapeDtypeStruct((n_pad, c_pad), jnp.float32),
        grid=(2, n_tiles),
        in_specs=[
            _const(x_pad), _const(xw1), a_spec,
            _const(b1), _const(w2), _const(b2),
            _const(wm1x), _const(wm1h1), _const(wm1h2), _const(bm1),
            _const(wm2), _const(bm2),
        ],
        out_specs=pl.BlockSpec((n_pad, c_pad), lambda p, t: (0, 0)),
        scratch_shapes=[
            pltpu.VMEM((n_pad, h_pad), jnp.bfloat16),   # h1
            pltpu.VMEM((n_pad, h_pad), jnp.bfloat16),   # h1 @ W2
        ],
        compiler_params=pltpu.CompilerParams(
            # scratch-mediated cross-tile/cross-pass dependencies => both axes sequential
            dimension_semantics=("arbitrary", "arbitrary"),
            vmem_limit_bytes=int(vmem_limit_bytes),
        ),
    )(x_pad, xw1, a_pad, b1, w2, b2, wm1x, wm1h1, wm1h2, bm1, wm2, bm2)
    return out


# ---------------------------------------------------------------------------
# One-time preparation (per graph / per set of weights): planning, casting,
# zero-padding.  Nothing here is re-executed on every forward call.
# ---------------------------------------------------------------------------
def prepare_jk(params, x, a_hat, *, tm=None, force_pipelined=False):
    assert len(params["gcn"]) == 2, "fused kernel is specialized to num_layers=2 (module default)"
    n, f_in = x.shape
    hidden = params["gcn"][0]["w"].shape[1]
    mlp_hidden = params["mlp_w1"].shape[1]
    out_c = params["mlp_w2"].shape[1]

    h_pad = _round_up(max(hidden, 1), 128)      # lane-dense hidden (GCN)
    hm_pad = _round_up(max(mlp_hidden, 1), 128)  # lane-dense hidden (MLP)
    c_pad = _round_up(max(out_c, 1), 128)        # lane-dense logits/output

    budget = _vmem_budget_bytes()
    n16 = _round_up(max(n, 16), 16)

    # VMEM that is resident regardless of how A_hat is fed (x, XW1, scratch, output, weights).
    fixed = (n16 * f_in * 2
             + n16 * h_pad * 2
             + 2 * n16 * h_pad * 2
             + n16 * c_pad * 4
             + (f_in * h_pad + h_pad * h_pad + f_in * hm_pad
                + 2 * h_pad * hm_pad + hm_pad * c_pad) * 2
             + (2 * h_pad + hm_pad + c_pad) * 4)

    # Count resident A_hat at 2x (in case Pallas still allocates a second buffer).
    a_resident = (not force_pipelined) and (2 * n16 * n16 * 2 + fixed <= budget)

    if tm is None:
        if a_resident:
            tm = min(256, n16)
        else:
            avail = max(budget - fixed, 4 * n16 * 2 * 16)
            tm = avail // (2 * n16 * 2)           # double-buffered bf16 (tm, n_pad) tile
            tm = max(16, min(256, (tm // 16) * 16))
    tm = max(16, _round_up(min(int(tm), n16), 16))
    n_pad = _round_up(n, tm)

    # --- one-time bf16 cast + zero-pad of the big operands (NOT inside the forward) ---
    x_bf = x.astype(jnp.bfloat16)
    a_bf = a_hat.astype(jnp.bfloat16)
    if n_pad != n:
        x_bf = jnp.pad(x_bf, ((0, n_pad - n), (0, 0)))
        a_bf = jnp.pad(a_bf, ((0, n_pad - n), (0, n_pad - n)))

    def pad2(w, r, c):
        return jnp.pad(w, ((0, r - w.shape[0]), (0, c - w.shape[1])))

    w1 = pad2(params["gcn"][0]["w"].astype(jnp.bfloat16), f_in, h_pad)
    b1 = jnp.pad(params["gcn"][0]["b"].astype(jnp.float32), (0, h_pad - hidden)).reshape(1, -1)
    w2 = pad2(params["gcn"][1]["w"].astype(jnp.bfloat16), h_pad, h_pad)
    b2 = jnp.pad(params["gcn"][1]["b"].astype(jnp.float32), (0, h_pad - hidden)).reshape(1, -1)

    wm1 = params["mlp_w1"]
    wm1x = pad2(wm1[:f_in].astype(jnp.bfloat16), f_in, hm_pad)
    wm1h1 = pad2(wm1[f_in:f_in + hidden].astype(jnp.bfloat16), h_pad, hm_pad)
    wm1h2 = pad2(wm1[f_in + hidden:].astype(jnp.bfloat16), h_pad, hm_pad)
    bm1 = jnp.pad(params["mlp_b1"].astype(jnp.float32), (0, hm_pad - mlp_hidden)).reshape(1, -1)
    wm2 = pad2(params["mlp_w2"].astype(jnp.bfloat16), hm_pad, c_pad)
    # Padded logit columns get a very negative bias so softmax sends them to ~0.
    bm2 = jnp.pad(params["mlp_b2"].astype(jnp.float32), (0, c_pad - out_c),
                  constant_values=-1e30).reshape(1, -1)

    return dict(
        x_pad=x_bf, a_pad=a_bf,
        weights=(w1, b1, w2, b2, wm1x, wm1h1, wm1h2, bm1, wm2, bm2),
        tm=int(tm), a_resident=bool(a_resident),
        vmem_limit_bytes=int(budget),
        out_channels=int(out_c),
    )


def jumping_knowledge_forward(prep, batch_size):
    out = _forward_padded(
        prep["x_pad"], prep["a_pad"], *prep["weights"],
        tm=prep["tm"], a_resident=prep["a_resident"],
        vmem_limit_bytes=prep["vmem_limit_bytes"])
    return out[:batch_size, :prep["out_channels"]]


# ---------------------------------------------------------------------------
# Parameters, normalized adjacency (built ONCE per graph), pure-JAX f32 reference.
# ---------------------------------------------------------------------------
def glorot(key, shape):
    fan_in, fan_out = shape
    lim = jnp.sqrt(6.0 / (fan_in + fan_out))
    return jax.random.uniform(key, shape, jnp.float32, -lim, lim)


def init_params(key, in_channels, hidden_channels, out_channels, num_layers=2):
    keys = jax.random.split(key, num_layers + 2)
    params = {"gcn": []}
    dims = [in_channels] + [hidden_channels] * num_layers
    for i in range(num_layers):
        params["gcn"].append({
            "w": glorot(keys[i], (dims[i], dims[i + 1])),
            "b": jnp.zeros((dims[i + 1],), jnp.float32),
        })
    mlp_in = in_channels + hidden_channels * num_layers
    params["mlp_w1"] = glorot(keys[num_layers], (mlp_in, hidden_channels))
    params["mlp_b1"] = jnp.zeros((hidden_channels,), jnp.float32)
    params["mlp_w2"] = glorot(keys[num_layers + 1], (hidden_channels, out_channels))
    params["mlp_b2"] = jnp.zeros((out_channels,), jnp.float32)
    return params


def build_normalized_adjacency(edge_index, num_nodes):
    # A_hat = D^{-1/2} (A + I) D^{-1/2}  -- dense GCN normalization (add_self_loops=True).
    src, dst = edge_index[0], edge_index[1]
    a = jnp.zeros((num_nodes, num_nodes), jnp.float32)
    a = a.at[dst, src].add(1.0)
    a = a + jnp.eye(num_nodes, dtype=jnp.float32)
    deg = jnp.sum(a, axis=1)
    d_inv_sqrt = jax.lax.rsqrt(deg)
    return a * d_inv_sqrt[:, None] * d_inv_sqrt[None, :]


def reference_forward(params, x, a_hat, batch_size):
    feats = [x]
    hcur = x
    for layer in params["gcn"]:
        hcur = jnp.maximum(a_hat @ (hcur @ layer["w"]) + layer["b"], 0.0)
        feats.append(hcur)
    xc = jnp.concatenate(feats, axis=1)
    z = jnp.maximum(xc @ params["mlp_w1"] + params["mlp_b1"], 0.0)
    logits = z @ params["mlp_w2"] + params["mlp_b2"]
    return jax.nn.softmax(logits[:batch_size], axis=1)


if __name__ == "__main__":
    key = jax.random.PRNGKey(0)
    k_x, k_e, k_p = jax.random.split(key, 3)

    num_nodes = 64
    in_channels = 8
    hidden_channels = 16
    out_channels = 4
    num_edges = 128
    batch_size = 8

    x = jax.random.normal(k_x, (num_nodes, in_channels), jnp.float32)
    edge_index = jax.random.randint(k_e, (2, num_edges), 0, num_nodes, jnp.int32)
    params = init_params(k_p, in_channels, hidden_channels, out_channels, num_layers=2)

    # Dense normalized adjacency, cast/pad done once (outside the per-call forward).
    a_hat = build_normalized_adjacency(edge_index, num_nodes)
    ref = reference_forward(params, x, a_hat, batch_size)

    # Path 1 (preferred at this size): A_hat resident in VMEM, DMA'd once total.
    prep_res = prepare_jk(params, x, a_hat)
    out_res = jax.block_until_ready(jumping_knowledge_forward(prep_res, batch_size))

    # Path 2: pipelined (tm, N) A_hat row tiles (large-graph fallback), forced here
    # with tm=16 so the multi-tile, two-pass grid is exercised as well.
    prep_pipe = prepare_jk(params, x, a_hat, tm=16, force_pipelined=True)
    out_pipe = jax.block_until_ready(jumping_knowledge_forward(prep_pipe, batch_size))

    for out in (out_res, out_pipe):
        assert out.shape == (batch_size, out_channels)
        assert bool(jnp.all(jnp.isfinite(out)))
        assert bool(jnp.allclose(jnp.sum(out, axis=1), 1.0, atol=1e-2))
        assert bool(jnp.allclose(out, ref, atol=5e-2)), float(jnp.max(jnp.abs(out - ref)))
    print("KERNEL_OK")
</pallas_src>

<mosaic_0001>
module attributes {stable_mosaic.version = 11 : i64} {
  func.func @_fused_jk_kernel(%arg0: i32, %arg1: i32, %arg2: memref<64x8xbf16, #tpu.memory_space<vmem>>, %arg3: memref<64x128xbf16, #tpu.memory_space<vmem>>, %arg4: memref<64x64xbf16, #tpu.memory_space<vmem>>, %arg5: memref<1x128xf32, #tpu.memory_space<vmem>>, %arg6: memref<128x128xbf16, #tpu.memory_space<vmem>>, %arg7: memref<1x128xf32, #tpu.memory_space<vmem>>, %arg8: memref<8x128xbf16, #tpu.memory_space<vmem>>, %arg9: memref<128x128xbf16, #tpu.memory_space<vmem>>, %arg10: memref<128x128xbf16, #tpu.memory_space<vmem>>, %arg11: memref<1x128xf32, #tpu.memory_space<vmem>>, %arg12: memref<128x128xbf16, #tpu.memory_space<vmem>>, %arg13: memref<1x128xf32, #tpu.memory_space<vmem>>, %arg14: memref<64x128xf32, #tpu.memory_space<vmem>>, %arg15: memref<64x128xbf16, #tpu.memory_space<vmem>>, %arg16: memref<64x128xbf16, #tpu.memory_space<vmem>>) attributes {dimension_semantics = [#tpu.dimension_semantics<arbitrary>, #tpu.dimension_semantics<arbitrary>], iteration_bounds = array<i64: 2, 1>, scalar_prefetch = 0 : i64, scratch_operands = 2 : i64, tpu.core_type = #tpu.core_type<tc>, window_params = [{pipeline_mode = #tpu.pipeline_mode<synchronous>, transform_indices = @transform_0, window_bounds = array<i64: 64, 8>}, {pipeline_mode = #tpu.pipeline_mode<synchronous>, transform_indices = @transform_1, window_bounds = array<i64: 64, 128>}, {pipeline_mode = #tpu.pipeline_mode<synchronous>, transform_indices = @transform_2, window_bounds = array<i64: 64, 64>}, {pipeline_mode = #tpu.pipeline_mode<synchronous>, transform_indices = @transform_3, window_bounds = array<i64: 1, 128>}, {pipeline_mode = #tpu.pipeline_mode<synchronous>, transform_indices = @transform_4, window_bounds = array<i64: 128, 128>}, {pipeline_mode = #tpu.pipeline_mode<synchronous>, transform_indices = @transform_5, window_bounds = array<i64: 1, 128>}, {pipeline_mode = #tpu.pipeline_mode<synchronous>, transform_indices = @transform_6, window_bounds = array<i64: 8, 128>}, {pipeline_mode = #tpu.pipeline_mode<synchronous>, transform_indices = @transform_7, window_bounds = array<i64: 128, 128>}, {pipeline_mode = #tpu.pipeline_mode<synchronous>, transform_indices = @transform_8, window_bounds = array<i64: 128, 128>}, {pipeline_mode = #tpu.pipeline_mode<synchronous>, transform_indices = @transform_9, window_bounds = array<i64: 1, 128>}, {pipeline_mode = #tpu.pipeline_mode<synchronous>, transform_indices = @transform_10, window_bounds = array<i64: 128, 128>}, {pipeline_mode = #tpu.pipeline_mode<synchronous>, transform_indices = @transform_11, window_bounds = array<i64: 1, 128>}, {pipeline_mode = #tpu.pipeline_mode<synchronous>, transform_indices = @transform_12, window_bounds = array<i64: 64, 128>}]} {
    %c64_i32 = arith.constant 64 : i32
    %0 = arith.muli %arg1, %c64_i32 : i32
    %1 = tpu.assume_multiple %0, 64 : i32
    %2 = arith.index_cast %1 : i32 to index
    %c0 = arith.constant 0 : index
    %3 = vector.load %arg4[%2, %c0] : memref<64x64xbf16, #tpu.memory_space<vmem>>, vector<64x64xbf16>
    %c0_i32 = arith.constant 0 : i32
    %4 = arith.cmpi eq, %arg0, %c0_i32 : i32
    %5 = arith.extui %4 : i1 to i32
    %c0_i32_0 = arith.constant 0 : i32
    %6 = arith.cmpi ne, %5, %c0_i32_0 : i32
    scf.if %6 {
      %c0_2 = arith.constant 0 : index
      %c0_3 = arith.constant 0 : index
      %10 = vector.load %arg3[%c0_2, %c0_3] : memref<64x128xbf16, #tpu.memory_space<vmem>>, vector<64x128xbf16>
      %cst = arith.constant dense<0.000000e+00> : vector<64x128xf32>
      %11 = tpu.matmul %3, %10, %cst {dimension_numbers = #tpu.dot_dimension_numbers<[1], [0], [0], [1], [0, 0, 1, 1], [], []>} : vector<64x64xbf16>, vector<64x128xbf16>, vector<64x128xf32> -> vector<64x128xf32>
      %c0_4 = arith.constant 0 : index
      %c0_5 = arith.constant 0 : index
      %12 = vector.load %arg5[%c0_4, %c0_5] : memref<1x128xf32, #tpu.memory_space<vmem>>, vector<1x128xf32>
      %13 = vector.broadcast %12 : vector<1x128xf32> to vector<64x128xf32>
      %14 = arith.addf %11, %13 : vector<64x128xf32>
      %cst_6 = arith.constant 0.000000e+00 : f32
      %15 = vector.broadcast %cst_6 : f32 to vector<64x128xf32>
      %16 = arith.maximumf %14, %15 : vector<64x128xf32>
      %17 = arith.truncf %16 : vector<64x128xf32> to vector<64x128xbf16>
      %18 = arith.index_cast %1 : i32 to index
      %c0_7 = arith.constant 0 : index
      %19 = vector.load %arg15[%18, %c0_7] : memref<64x128xbf16, #tpu.memory_space<vmem>>, vector<64x128xbf16>
      tpu.vector_store %arg15[%18, %c0_7], %17 {strides = array<i32>} : memref<64x128xbf16, #tpu.memory_space<vmem>>, vector<64x128xbf16>,
      %c0_8 = arith.constant 0 : index
      %c0_9 = arith.constant 0 : index
      %20 = vector.load %arg6[%c0_8, %c0_9] : memref<128x128xbf16, #tpu.memory_space<vmem>>, vector<128x128xbf16>
      %cst_10 = arith.constant dense<0.000000e+00> : vector<64x128xf32>
      %21 = tpu.matmul %17, %20, %cst_10 {dimension_numbers = #tpu.dot_dimension_numbers<[1], [0], [0], [1], [0, 0, 1, 1], [], []>} : vector<64x128xbf16>, vector<128x128xbf16>, vector<64x128xf32> -> vector<64x128xf32>
      %22 = arith.truncf %21 : vector<64x128xf32> to vector<64x128xbf16>
      %23 = arith.index_cast %1 : i32 to index
      %c0_11 = arith.constant 0 : index
      %24 = vector.load %arg16[%23, %c0_11] : memref<64x128xbf16, #tpu.memory_space<vmem>>, vector<64x128xbf16>
      tpu.vector_store %arg16[%23, %c0_11], %22 {strides = array<i32>} : memref<64x128xbf16, #tpu.memory_space<vmem>>, vector<64x128xbf16>,
    } else {
    }
    %c1_i32 = arith.constant 1 : i32
    %7 = arith.cmpi eq, %arg0, %c1_i32 : i32
    %8 = arith.extui %7 : i1 to i32
    %c0_i32_1 = arith.constant 0 : i32
    %9 = arith.cmpi ne, %8, %c0_i32_1 : i32
    scf.if %9 {
      %c0_2 = arith.constant 0 : index
      %c0_3 = arith.constant 0 : index
      %10 = vector.load %arg16[%c0_2, %c0_3] : memref<64x128xbf16, #tpu.memory_space<vmem>>, vector<64x128xbf16>
      %cst = arith.constant dense<0.000000e+00> : vector<64x128xf32>
      %11 = tpu.matmul %3, %10, %cst {dimension_numbers = #tpu.dot_dimension_numbers<[1], [0], [0], [1], [0, 0, 1, 1], [], []>} : vector<64x64xbf16>, vector<64x128xbf16>, vector<64x128xf32> -> vector<64x128xf32>
      %c0_4 = arith.constant 0 : index
      %c0_5 = arith.constant 0 : index
      %12 = vector.load %arg7[%c0_4, %c0_5] : memref<1x128xf32, #tpu.memory_space<vmem>>, vector<1x128xf32>
      %13 = vector.broadcast %12 : vector<1x128xf32> to vector<64x128xf32>
      %14 = arith.addf %11, %13 : vector<64x128xf32>
      %cst_6 = arith.constant 0.000000e+00 : f32
      %15 = vector.broadcast %cst_6 : f32 to vector<64x128xf32>
      %16 = arith.maximumf %14, %15 : vector<64x128xf32>
      %17 = arith.truncf %16 : vector<64x128xf32> to vector<64x128xbf16>
      %18 = arith.index_cast %1 : i32 to index
      %c0_7 = arith.constant 0 : index
      %19 = vector.load %arg2[%18, %c0_7] : memref<64x8xbf16, #tpu.memory_space<vmem>>, vector<64x8xbf16>
      %20 = arith.index_cast %1 : i32 to index
      %c0_8 = arith.constant 0 : index
      %21 = vector.load %arg15[%20, %c0_8] : memref<64x128xbf16, #tpu.memory_space<vmem>>, vector<64x128xbf16>
      %c0_9 = arith.constant 0 : index
      %c0_10 = arith.constant 0 : index
      %22 = vector.load %arg8[%c0_9, %c0_10] : memref<8x128xbf16, #tpu.memory_space<vmem>>, vector<8x128xbf16>
      %cst_11 = arith.constant dense<0.000000e+00> : vector<64x128xf32>
      %23 = tpu.matmul %19, %22, %cst_11 {dimension_numbers = #tpu.dot_dimension_numbers<[1], [0], [0], [1], [0, 0, 1, 1], [], []>} : vector<64x8xbf16>, vector<8x128xbf16>, vector<64x128xf32> -> vector<64x128xf32>
      %c0_12 = arith.constant 0 : index
      %c0_13 = arith.constant 0 : index
      %24 = vector.load %arg9[%c0_12, %c0_13] : memref<128x128xbf16, #tpu.memory_space<vmem>>, vector<128x128xbf16>
      %cst_14 = arith.constant dense<0.000000e+00> : vector<64x128xf32>
      %25 = tpu.matmul %21, %24, %cst_14 {dimension_numbers = #tpu.dot_dimension_numbers<[1], [0], [0], [1], [0, 0, 1, 1], [], []>} : vector<64x128xbf16>, vector<128x128xbf16>, vector<64x128xf32> -> vector<64x128xf32>
      %26 = arith.addf %23, %25 : vector<64x128xf32>
      %c0_15 = arith.constant 0 : index
      %c0_16 = arith.constant 0 : index
      %27 = vector.load %arg10[%c0_15, %c0_16] : memref<128x128xbf16, #tpu.memory_space<vmem>>, vector<128x128xbf16>
      %cst_17 = arith.constant dense<0.000000e+00> : vector<64x128xf32>
      %28 = tpu.matmul %17, %27, %cst_17 {dimension_numbers = #tpu.dot_dimension_numbers<[1], [0], [0], [1], [0, 0, 1, 1], [], []>} : vector<64x128xbf16>, vector<128x128xbf16>, vector<64x128xf32> -> vector<64x128xf32>
      %29 = arith.addf %26, %28 : vector<64x128xf32>
      %c0_18 = arith.constant 0 : index
      %c0_19 = arith.constant 0 : index
      %30 = vector.load %arg11[%c0_18, %c0_19] : memref<1x128xf32, #tpu.memory_space<vmem>>, vector<1x128xf32>
      %31 = vector.broadcast %30 : vector<1x128xf32> to vector<64x128xf32>
      %32 = arith.addf %29, %31 : vector<64x128xf32>
      %cst_20 = arith.constant 0.000000e+00 : f32
      %33 = vector.broadcast %cst_20 : f32 to vector<64x128xf32>
      %34 = arith.maximumf %32, %33 : vector<64x128xf32>
      %35 = arith.truncf %34 : vector<64x128xf32> to vector<64x128xbf16>
      %c0_21 = arith.constant 0 : index
      %c0_22 = arith.constant 0 : index
      %36 = vector.load %arg12[%c0_21, %c0_22] : memref<128x128xbf16, #tpu.memory_space<vmem>>, vector<128x128xbf16>
      %cst_23 = arith.constant dense<0.000000e+00> : vector<64x128xf32>
      %37 = tpu.matmul %35, %36, %cst_23 {dimension_numbers = #tpu.dot_dimension_numbers<[1], [0], [0], [1], [0, 0, 1, 1], [], []>} : vector<64x128xbf16>, vector<128x128xbf16>, vector<64x128xf32> -> vector<64x128xf32>
      %c0_24 = arith.constant 0 : index
      %c0_25 = arith.constant 0 : index
      %38 = vector.load %arg13[%c0_24, %c0_25] : memref<1x128xf32, #tpu.memory_space<vmem>>, vector<1x128xf32>
      %39 = vector.broadcast %38 : vector<1x128xf32> to vector<64x128xf32>
      %40 = arith.addf %37, %39 : vector<64x128xf32>
      %cst_26 = arith.constant dense<0xFF800000> : vector<64xf32>
      %41 = vector.multi_reduction <maximumf>, %40, %cst_26 [1] : vector<64x128xf32> to vector<64xf32>
      %42 = vector.shape_cast %41 : vector<64xf32> to vector<64x1xf32>
      %43 = vector.broadcast %42 : vector<64x1xf32> to vector<64x128xf32>
      %44 = arith.subf %40, %43 : vector<64x128xf32>
      %45 = math.exp %44 : vector<64x128xf32>
      %cst_27 = arith.constant dense<0.000000e+00> : vector<64xf32>
      %46 = vector.multi_reduction <add>, %45, %cst_27 [1] : vector<64x128xf32> to vector<64xf32>
      %47 = vector.shape_cast %46 : vector<64xf32> to vector<64x1xf32>
      %48 = tpu.reciprocal %47 {approx = true} : vector<64x1xf32> -> vector<64x1xf32>
      %49 = vector.broadcast %48 : vector<64x1xf32> to vector<64x128xf32>
      %50 = arith.mulf %45, %49 : vector<64x128xf32>
      %51 = arith.index_cast %1 : i32 to index
      %c0_28 = arith.constant 0 : index
      %52 = vector.load %arg14[%51, %c0_28] : memref<64x128xf32, #tpu.memory_space<vmem>>, vector<64x128xf32>
      tpu.vector_store %arg14[%51, %c0_28], %50 {strides = array<i32>} : memref<64x128xf32, #tpu.memory_space<vmem>>, vector<64x128xf32>,
    } else {
    }
    return
  }
  func.func @transform_0(%arg0: i32, %arg1: i32) -> (i32, i32) {
    %c0_i32 = arith.constant 0 : i32
    %c0_i32_0 = arith.constant 0 : i32
    %c0_i32_1 = arith.constant 0 : i32
    return %c0_i32, %c0_i32_0 : i32, i32
  }
  func.func @transform_1(%arg0: i32, %arg1: i32) -> (i32, i32) {
    %c0_i32 = arith.constant 0 : i32
    %c0_i32_0 = arith.constant 0 : i32
    %c0_i32_1 = arith.constant 0 : i32
    return %c0_i32, %c0_i32_0 : i32, i32
  }
  func.func @transform_2(%arg0: i32, %arg1: i32) -> (i32, i32) {
    %c0_i32 = arith.constant 0 : i32
    %c0_i32_0 = arith.constant 0 : i32
    %c0_i32_1 = arith.constant 0 : i32
    return %c0_i32, %c0_i32_0 : i32, i32
  }
  func.func @transform_3(%arg0: i32, %arg1: i32) -> (i32, i32) {
    %c0_i32 = arith.constant 0 : i32
    %c0_i32_0 = arith.constant 0 : i32
    %c0_i32_1 = arith.constant 0 : i32
    return %c0_i32, %c0_i32_0 : i32, i32
  }
  func.func @transform_4(%arg0: i32, %arg1: i32) -> (i32, i32) {
    %c0_i32 = arith.constant 0 : i32
    %c0_i32_0 = arith.constant 0 : i32
    %c0_i32_1 = arith.constant 0 : i32
    return %c0_i32, %c0_i32_0 : i32, i32
  }
  func.func @transform_5(%arg0: i32, %arg1: i32) -> (i32, i32) {
    %c0_i32 = arith.constant 0 : i32
    %c0_i32_0 = arith.constant 0 : i32
    %c0_i32_1 = arith.constant 0 : i32
    return %c0_i32, %c0_i32_0 : i32, i32
  }
  func.func @transform_6(%arg0: i32, %arg1: i32) -> (i32, i32) {
    %c0_i32 = arith.constant 0 : i32
    %c0_i32_0 = arith.constant 0 : i32
    %c0_i32_1 = arith.constant 0 : i32
    return %c0_i32, %c0_i32_0 : i32, i32
  }
  func.func @transform_7(%arg0: i32, %arg1: i32) -> (i32, i32) {
    %c0_i32 = arith.constant 0 : i32
    %c0_i32_0 = arith.constant 0 : i32
    %c0_i32_1 = arith.constant 0 : i32
    return %c0_i32, %c0_i32_0 : i32, i32
  }
  func.func @transform_8(%arg0: i32, %arg1: i32) -> (i32, i32) {
    %c0_i32 = arith.constant 0 : i32
    %c0_i32_0 = arith.constant 0 : i32
    %c0_i32_1 = arith.constant 0 : i32
    return %c0_i32, %c0_i32_0 : i32, i32
  }
  func.func @transform_9(%arg0: i32, %arg1: i32) -> (i32, i32) {
    %c0_i32 = arith.constant 0 : i32
    %c0_i32_0 = arith.constant 0 : i32
    %c0_i32_1 = arith.constant 0 : i32
    return %c0_i32, %c0_i32_0 : i32, i32
  }
  func.func @transform_10(%arg0: i32, %arg1: i32) -> (i32, i32) {
    %c0_i32 = arith.constant 0 : i32
    %c0_i32_0 = arith.constant 0 : i32
    %c0_i32_1 = arith.constant 0 : i32
    return %c0_i32, %c0_i32_0 : i32, i32
  }
  func.func @transform_11(%arg0: i32, %arg1: i32) -> (i32, i32) {
    %c0_i32 = arith.constant 0 : i32
    %c0_i32_0 = arith.constant 0 : i32
    %c0_i32_1 = arith.constant 0 : i32
    return %c0_i32, %c0_i32_0 : i32, i32
  }
  func.func @transform_12(%arg0: i32, %arg1: i32) -> (i32, i32) {
    %c0_i32 = arith.constant 0 : i32
    %c0_i32_0 = arith.constant 0 : i32
    %c0_i32_1 = arith.constant 0 : i32
    return %c0_i32, %c0_i32_0 : i32, i32
  }
}

</mosaic_0001>

<bundles_post_ra>
// kernel: _forward_padded.1
= control target key start
LH: loop header
LB: loop body
LE: loop exit
PB: predicated region body
PF: predicated region fallthrough
CT: control target
= control target key end

     0   :  { %s2626_s0 = inlined_call_operand.vmem [shape: bf16[64,8], index: 0, kind: input, shape index: {}]   ;;  %s2627_s1 = inlined_call_operand.vmem [shape: bf16[64,128], index: 1, kind: input, shape index: {}]   ;;  %s2628_s2 = inlined_call_operand.hbm [shape: bf16[64,64], index: 2, kind: input, shape index: {}]   ;;  %s2629_s3 = inlined_call_operand.vmem [shape: f32[1,128], index: 3, kind: input, shape index: {}]   ;;  %s2630_s4 = inlined_call_operand.vmem [shape: bf16[128,128], index: 4, kind: input, shape index: {}]   ;;  %s2631_s5 = inlined_call_operand.vmem [shape: f32[1,128], index: 5, kind: input, shape index: {}]   ;;  %s2632_s6 = inlined_call_operand.vmem [shape: bf16[8,128], index: 6, kind: input, shape index: {}]   ;;  %s2633_s7 = inlined_call_operand.hbm [shape: bf16[128,128], index: 7, kind: input, shape index: {}]   ;;  %s2634_s8 = inlined_call_operand.hbm [shape: bf16[128,128], index: 8, kind: input, shape index: {}]   ;;  %s2635_s9 = inlined_call_operand.vmem [shape: f32[1,128], index: 9, kind: input, shape index: {}]   ;;  %s2636_s10 = inlined_call_operand.hbm [shape: bf16[128,128], index: 10, kind: input, shape index: {}]   ;;  %s2637_s11 = inlined_call_operand.vmem [shape: f32[1,128], index: 11, kind: input, shape index: {}]   ;;  %s2638_s12 = inlined_call_operand.hbm [shape: f32[64,128], index: 12, kind: output, shape index: {}]  }
   0x1   :  { %2646 = sst [smem:[#allocation19_spill]] %s2633_s7 }
   0x2   :  { %2647 = sst [smem:[#allocation20_spill]] %s2637_s11 }
   0x3   :  { %2648 = sst [smem:[#allocation21_spill]] %s2638_s12 }
   0x4   :  { %17 = vsyncpa [#allocation5], 0 }
   0x5   :  { %18 = vsyncpa [#allocation8], 0 }
   0x6   :  { %19 = vsyncpa [#allocation11], 0 }
   0x7   :  { %20 = vsyncpa [#allocation6], 0  ;;  %s2324_s21 = smov 0   ;;  %s2326_s22 = smov 0  }
   0x8   :  { %s2328_s23 = smov 0  }
   0x9 LB: > { %2649 = sst [smem:[#allocation17_spill]] %s2244_s22  ;;  %s2639_s24 = sadd.s32 4294967295, %s2248_s23   ;;  %s2248_s23 = sphi %s2328_s23, %s26_s23   ;;  %s2244_s22 = sphi %s2326_s22, %s2666_s22   ;;  %s2240_s21 = sphi %s2324_s21, %s2665_s21  }
   0xa   : > { %2650 = sst [smem:[#allocation18_spill]] %s2248_s23  ;;  %p1620_p0 = scmp.ge.s32.totalorder %s2248_s23, 1 }
   0xb   : > { %p316_p1 = scmp.lt.s32.totalorder %s2248_s23, 3  ;;  %p2344_p2 = scmp.eq.s32.totalorder %s2639_s24, 0 }
   0xc   : > { %s2250_s27 = smov [#allocation7]   ;;  %s38_s30 = sadd.s32 1, %s2244_s22 }
   0xd   : > { %s2651_s25 = scalar_select %p2344_p2, 1, 0 }
   0xe   : > { %p2348_p3 = pnand %p1620_p0, %p316_p1  ;;  %s359_s28 = sshll.u32 %s2250_s27, 4  ;;  %s2352_s28 = int_to_ptr.vmem [resolvable:$true] %s359_s28 }
   0xf   : > { %p2363_p6 = scmp.ge.s32.totalorder %s38_s30, 2  ;;  %s2251_s14 = smov [#allocation4]  }
  0x10   : > { %s2652_s26 = scalar_select %p2348_p3, 1, 0 }
  0x11   : > { %p1944_p4 = pneg %p2348_p3  ;;  %s334_s15 = sshll.u32 %s2251_s14, 4  ;;  %s335_s15 = int_to_ptr.vmem [resolvable:$true] %s334_s15 }
  0x12   : > { %s2655_s7 = sld [smem:[#allocation19_spill]] }
  0x13   : > { %p2358_p5 = pnand %p2344_p2, %p1944_p4 }
  0x15   : > { %p2375_p8 = pneg %p2358_p5 }
  0x18   : > { %s2072_s18 = scalar_lea.hbm %s2655_s7, 1024 }
  0x19   : > { %p2073_p7 = scmp.ne.s32.totalorder %s2655_s7, %s2072_s18  ;;  %p2079_p11 = scmp.lt.u32.totalorder %s2072_s18, %s2655_s7 }
  0x1b   : > { %p2075_p9 = pnand %p2375_p8, %p2073_p7 }
  0x1d   : > { %p2076_p10 = pneg %p2075_p9 }
  0x1f   : > { %p2081_p12 = pnand %p2079_p11, %p2076_p10 }
  0x21   : > { %2084 = shalt.err (!%p2081_p12)
}
  0x22   : > { %s2085_s14 = scalar_lea.vmem %s2352_s28, 1024  ;;  %p2093_p4 = scmp.lt.s32.totalorder %s2352_s28, %s2352_s28 }
  0x23   : > { %p2086_p13 = scmp.ne.s32.totalorder %s2352_s28, %s2085_s14  ;;  %p2094_p2 = scmp.lt.s32.totalorder %s2085_s14, %s2085_s14 }
  0x25   : > { %p2088_p0 = pnand %p2086_p13, %p2375_p8  ;;  %p2095_p7 = por %p2094_p2, %p2093_p4 }
  0x27   : > { %p2089_p1 = pneg %p2088_p0 }
  0x29   : > { %p2096_p9 = pnand %p2095_p7, %p2089_p1 }
  0x2b   : > { %2099 = shalt.err (!%p2096_p9)
}
  0x2c   : > { %s2252_s16 = smov 64   ;;  %s2253_s22 = smov 4  }
  0x2d   : > { %1950 = dma.hbm_to_vmem [thread:$0]  (!%p2358_p5), %s2655_s7, 1024, %s2352_s28, [#allocation8], %s2252_s16, %s2252_s16, %s2253_s22  }
  0x2e   : > { %s2668_s30 = smov (%p2363_p6, %s38_s30), 0  ;;  %s2100_s20 = scalar_lea.hbm %s2628_s2, 512 }
  0x2f   : > { %p2101_p2 = scmp.ne.s32.totalorder %s2628_s2, %s2100_s20  ;;  %p2107_p12 = scmp.lt.u32.totalorder %s2100_s20, %s2628_s2 }
  0x31   : > { %p2103_p10 = pnand %p2101_p2, %p2375_p8 }
  0x33   : > { %p2104_p11 = pneg %p2103_p10 }
  0x35   : > { %p2109_p13 = pnand %p2107_p12, %p2104_p11 }
  0x37   : > { %2112 = shalt.err (!%p2109_p13)
}
  0x38   : > { %s2113_s28 = scalar_lea.vmem %s335_s15, 512  ;;  %p2121_p4 = scmp.lt.s32.totalorder %s335_s15, %s335_s15 }
  0x39   : > { %p2114_p6 = scmp.ne.s32.totalorder %s335_s15, %s2113_s28  ;;  %p2122_p7 = scmp.lt.s32.totalorder %s2113_s28, %s2113_s28 }
  0x3b   : > { %p2116_p0 = pnand %p2114_p6, %p2375_p8  ;;  %p2123_p9 = por %p2122_p7, %p2121_p4 }
  0x3d   : > { %p2117_p1 = pneg %p2116_p0 }
  0x3f   : > { %p2124_p3 = pnand %p2123_p9, %p2117_p1 }
  0x41   : > { %2127 = shalt.err (!%p2124_p3)
}
  0x42   : > { %1947 = dma.hbm_to_vmem [thread:$0]  (!%p2358_p5), %s2628_s2, 512, %s335_s15, [#allocation5], %s2252_s16, %s2252_s16, %s2253_s22  }
  0x43   : > { %s2254_s23 = smov [#allocation9]   ;;  %s2255_s24 = smov [#allocation10]  }
  0x44   : > { %s372_s13 = sshll.u32 %s2254_s23, 4  ;;  %s388_s17 = sshll.u32 %s2255_s24, 4  ;;  %s373_s13 = int_to_ptr.vmem [resolvable:$true] %s372_s13  ;;  %s389_s17 = int_to_ptr.vmem [resolvable:$true] %s388_s17 }
  0x45   : > { %s2128_s20 = scalar_lea.hbm %s2634_s8, 1024 }
  0x46   : > { %p2129_p3 = scmp.ne.s32.totalorder %s2634_s8, %s2128_s20  ;;  %p2135_p11 = scmp.lt.u32.totalorder %s2128_s20, %s2634_s8 }
  0x48   : > { %p2131_p2 = pnand %p2129_p3, %p2375_p8 }
  0x4a   : > { %p2132_p10 = pneg %p2131_p2 }
  0x4c   : > { %p2137_p12 = pnand %p2135_p11, %p2132_p10 }
  0x4e   : > { %2140 = shalt.err (!%p2137_p12)
}
  0x4f   : > { %s2141_s15 = scalar_lea.vmem %s373_s13, 1024  ;;  %p2149_p1 = scmp.lt.s32.totalorder %s373_s13, %s373_s13 }
  0x50   : > { %p2142_p13 = scmp.ne.s32.totalorder %s373_s13, %s2141_s15  ;;  %p2150_p4 = scmp.lt.s32.totalorder %s2141_s15, %s2141_s15 }
  0x52   : > { %p2144_p6 = pnand %p2142_p13, %p2375_p8  ;;  %p2151_p7 = por %p2150_p4, %p2149_p1 }
  0x54   : > { %p2145_p0 = pneg %p2144_p6 }
  0x56   : > { %p2152_p9 = pnand %p2151_p7, %p2145_p0 }
  0x58   : > { %2155 = shalt.err (!%p2152_p9)
}
  0x59   : > { %1953 = dma.hbm_to_vmem [thread:$0]  (!%p2358_p5), %s2634_s8, 1024, %s373_s13, [#allocation8], %s2252_s16, %s2252_s16, %s2253_s22  }
  0x5a   : > { %s2156_s18 = scalar_lea.hbm %s2636_s10, 1024 }
  0x5b   : > { %p2157_p3 = scmp.ne.s32.totalorder %s2636_s10, %s2156_s18  ;;  %p2163_p11 = scmp.lt.u32.totalorder %s2156_s18, %s2636_s10 }
  0x5d   : > { %p2159_p2 = pnand %p2157_p3, %p2375_p8 }
  0x5f   : > { %p2160_p10 = pneg %p2159_p2 }
  0x61   : > { %p2165_p12 = pnand %p2163_p11, %p2160_p10 }
  0x63   : > { %2168 = shalt.err (!%p2165_p12)
}
  0x64   : > { %s2169_s11 = scalar_lea.vmem %s389_s17, 1024  ;;  %p2177_p1 = scmp.lt.s32.totalorder %s389_s17, %s389_s17 }
  0x65   : > { %p2170_p13 = scmp.ne.s32.totalorder %s389_s17, %s2169_s11  ;;  %p2178_p4 = scmp.lt.s32.totalorder %s2169_s11, %s2169_s11 }
  0x67   : > { %p2172_p6 = pnand %p2170_p13, %p2375_p8  ;;  %p2179_p7 = por %p2178_p4, %p2177_p1 }
  0x69   : > { %p2173_p0 = pneg %p2172_p6 }
  0x6b   : > { %p2180_p9 = pnand %p2179_p7, %p2173_p0 }
  0x6d   : > { %2183 = shalt.err (!%p2180_p9)
}
  0x6e   : > { %1956 = dma.hbm_to_vmem [thread:$0]  (!%p2358_p5), %s2636_s10, 1024, %s389_s17, [#allocation11], %s2252_s16, %s2252_s16, %s2253_s22  }
  0x6f   : > { %p2657_p3 = scmp.ne.s32.totalorder %s2652_s26, 0 }
  0x70   : > { %p2658_p8 = scmp.ne.s32.totalorder (!%p2657_p3), %s2651_s25, 0 }
  0x71   : > { %407 = sbr.rel (%p2657_p3) target bundleno = 1637 (0x665), region = 68 }
  0x78   : > { %2223 = dma.done.wait (%p2658_p8), [#allocation5], 512  }
  0x79   : > { %2225 = vsyncadd (%p2658_p8), [#allocation5], 4294966784 }
  0x7a   : > { %2227 = dma.done.wait (%p2658_p8), [#allocation8], 2048  }
  0x7b   : > { %2229 = vsyncadd (%p2658_p8), [#allocation8], 4294965248 }
  0x7c   : > { %2231 = dma.done.wait (%p2658_p8), [#allocation11], 1024  }
  0x7d   : > { %2233 = vsyncadd (%p2658_p8), [#allocation11], 4294966272  ;;  %v2480_v0 = vld [vmem:[#allocation4] sm:$0xf]  ;;  %v2482_v1 = vld [vmem:[#allocation4 + $0x4] sm:$0xf] }
  0x7e   : > { %v2484_v2 = vld [vmem:[#allocation4 + $0x8] sm:$0xf]  ;;  %v2486_v3 = vld [vmem:[#allocation4 + $0xc] sm:$0xf]  ;;  %v2488_v4 = vld [vmem:[#allocation4 + $0x10] sm:$0xf] }
  0x7f   : > { %v2490_v5 = vld [vmem:[#allocation4 + $0x14] sm:$0xf]  ;;  %v2492_v6 = vld [vmem:[#allocation4 + $0x18] sm:$0xf]  ;;  %v2494_v7 = vld [vmem:[#allocation4 + $0x1c] sm:$0xf] }
  0x80   : > { %p1630_p5 = scmp.ne.s32.totalorder %s2240_s21, 0 }
  0x81   : > { %v2000_v8 = vld [vmem:[%s2627_s1] sm:$0xff] (!%p1630_p5)   ;;  %v1632_v9 = vcombine.low (!%p1630_p5), %v2480_v0, %v2482_v1  ;;  %vm528_vm0 = vcmask (!%p1630_p5), 523264   ;;  %v2001_v10 = vld [vmem:[%s2627_s1 + $0x8] sm:$0xff] (!%p1630_p5)   ;;  %v2002_v11 = vld [vmem:[%s2627_s1 + $0x10] sm:$0xff] (!%p1630_p5)   ;;  %v1633_v17 = vcombine.low (!%p1630_p5), %v2484_v2, %v2486_v3  ;;  %v1634_v18 = vcombine.low (!%p1630_p5), %v2488_v4, %v2490_v5 }
  0x82   : > { %468 = sbr.rel (%p1630_p5) target bundleno = 594 (0x252), region = 88  ;;  %1769 = vmatprep.subr.bf16.mxu0 (!%p1630_p5), %v2000_v8  ;;  %v2004_v12 = vld [vmem:[%s2630_s4] sm:$0xff] (!%p1630_p5)   ;;  %v2005_v13 = vld [vmem:[%s2630_s4 + $0x8] sm:$0xff] (!%p1630_p5)   ;;  %v2003_v14 = vld [vmem:[%s2627_s1 + $0x18] sm:$0xff] (!%p1630_p5)   ;;  %v1635_v21 = vcombine.low (!%p1630_p5), %v2492_v6, %v2494_v7 }
  0x83   : > { %1777 = vmatprep.mubr.msk.bf16.mxu0 (!%p1630_p5), %vm528_vm0, %v1632_v9  ;;  %1770 = vmatpush3.bf16.msra.mxu0 (!%p1630_p5), %v2000_v8  ;;  %v2006_v15 = vld [vmem:[%s2630_s4 + $0x10] sm:$0xff] (!%p1630_p5)   ;;  %v2007_v16 = vld [vmem:[%s2630_s4 + $0x18] sm:$0xff] (!%p1630_p5)   ;;  %v2008_v19 = vld [vmem:[%s2630_s4 + $0x20] sm:$0xff] (!%p1630_p5)  }
  0x84   : > { %1771 = vmatprep.subr.bf16.mxu0 (!%p1630_p5), %v2001_v10  ;;  %1785 = vmatprep.subr.bf16.mxu1 (!%p1630_p5), %v2004_v12  ;;  %v2009_v20 = vld [vmem:[%s2630_s4 + $0x28] sm:$0xff] (!%p1630_p5)   ;;  %v2010_v22 = vld [vmem:[%s2630_s4 + $0x30] sm:$0xff] (!%p1630_p5)   ;;  %v2011_v23 = vld [vmem:[%s2630_s4 + $0x38] sm:$0xff] (!%p1630_p5)  }
  0x85   : > { %1786 = vmatpush3.bf16.msra.mxu1 (!%p1630_p5), %v2004_v12  ;;  %v1631_v24 = vld [vmem:[%s2629_s3] ss:$0 sm:$0xff] (!%p1630_p5) }
  0x86   : > { %1787 = vmatprep.subr.bf16.mxu1 (!%p1630_p5), %v2005_v13 }
  0x87   : > { %1772 = vmatpush3.bf16.msra.mxu0 (!%p1630_p5), %v2001_v10 }
  0x88   : > { %1773 = vmatprep.subr.bf16.mxu0 (!%p1630_p5), %v2002_v11 }
  0x89   : > { %1788 = vmatpush3.bf16.msra.mxu1 %v2005_v13 }
  0x8a   : > { %1789 = vmatprep.subr.bf16.mxu1 %v2006_v15 }
  0x8b   : > { %1774 = vmatpush3.bf16.msra.mxu0 %v2002_v11 }
  0x8c   : > { %1775 = vmatprep.subr.bf16.mxu0 %v2003_v14 }
  0x8d   : > { %1790 = vmatpush3.bf16.msra.mxu1 %v2006_v15 }
  0x8e   : > { %1791 = vmatprep.subr.bf16.mxu1 %v2007_v16 }
  0x8f   : > { %1776 = vmatpush3.bf16.msra.mxu0 %v2003_v14 }
  0x91   : > { %1792 = vmatpush3.bf16.msra.mxu1 %v2007_v16 }
  0x92   : > { %1778 = vmatmul.mubr.msk.bf16.vlgmr.msra.gmra.mrb[0].mxu0 %vm528_vm0, %v1633_v17  ;;  %1793 = vmatprep.subr.bf16.mxu1 %v2008_v19 }
  0x93   : > { %1781 = vmatprep.mubr.msk.bf16.mxu0 %vm528_vm0, %v1634_v18 }
  0x95   : > { %1794 = vmatpush3.bf16.msra.mxu1 %v2008_v19 }
  0x96   : > { %1795 = vmatprep.subr.bf16.mxu1 %v2009_v20 }
  0x99   : > { %1796 = vmatpush3.bf16.msra.mxu1 %v2009_v20 }
  0x9a   : > { %1782 = vmatmul.mubr.msk.bf16.gmra.mrb[4].mxu0 %vm528_vm0, %v1635_v21  ;;  %1797 = vmatprep.subr.bf16.mxu1 %v2010_v22 }
  0x9d   : > { %1798 = vmatpush3.bf16.msra.mxu1 %v2010_v22 }
  0x9e   : > { %1799 = vmatprep.subr.bf16.mxu1 %v2011_v23 }
  0xa1   : > { %1800 = vmatpush3.bf16.msra.mxu1 %v2011_v23 }
 0x165   : > { %v1779_v25 = vpop.f32.mrb[0].mxu0 }
 0x166   : > { %v584_v26 = vadd.f32 %v1779_v25, %v1631_v24  ;;  %v575_v27 = vpop.f32.mrb[1].mxu0 }
 0x167   : > { %v576_v28 = vadd.f32 %v1631_v24, %v575_v27  ;;  %v1780_v29 = vpop.f32.mrb[2].mxu0 }
 0x168   : > { %v587_v30 = vadd.f32 %v1780_v29, %v1631_v24  ;;  %v578_v31 = vpop.f32.mrb[3].mxu0  ;;  %v608_v33 = vmax.f32 %v584_v26, 0.0 }
 0x169   : > { %v579_v32 = vadd.f32 %v1631_v24, %v578_v31  ;;  %v606_v35 = vmax.f32 %v576_v28, 0.0 }
 0x16a   : > { %v609_v34 = vmax.f32 %v587_v30, 0.0 }
 0x16b   : > { %v607_v36 = vmax.f32 %v579_v32, 0.0 }
 0x16c   : > { %v615_v37 = vpack.c.bf16 %v609_v34, %v608_v33 }
 0x16d   : > { %v1783_v38 = vpop.f32.mrb[4].mxu0  ;;  %v614_v39 = vpack.c.bf16 %v607_v36, %v606_v35 }
 0x16e   : > { %623 = vst [vmem:[#allocation2 + $0x8] sm:$0xff] %v615_v37  ;;  %v600_v40 = vadd.f32 %v1783_v38, %v1631_v24  ;;  %v591_v41 = vpop.f32.mrb[5].mxu0 }
 0x16f   : > { %v592_v42 = vadd.f32 %v1631_v24, %v591_v41  ;;  %v1784_v43 = vpop.f32.mrb[6].mxu0  ;;  %622 = vst [vmem:[#allocation2] sm:$0xff] %v614_v39  ;;  %1801 = vmatprep.mubr.bf16.mxu1 %v614_v39 }
 0x170   : > { %v603_v44 = vadd.f32 %v1784_v43, %v1631_v24  ;;  %v594_v45 = vpop.f32.mrb[7].mxu0  ;;  %1802 = vmatmul.mubr.bf16.vlgmr.msra.gmra.mrb[0].mxu1 %v615_v37  ;;  %v612_v47 = vmax.f32 %v600_v40, 0.0 }
 0x171   : > { %v595_v46 = vadd.f32 %v1631_v24, %v594_v45  ;;  %v610_v49 = vmax.f32 %v592_v42, 0.0 }
 0x172   : > { %v613_v48 = vmax.f32 %v603_v44, 0.0 }
 0x173   : > { %v611_v50 = vmax.f32 %v595_v46, 0.0 }
 0x174   : > { %v617_v51 = vpack.c.bf16 %v613_v48, %v612_v47 }
 0x175   : > { %v616_v52 = vpack.c.bf16 %v611_v50, %v610_v49 }
 0x176   : > { %625 = vst [vmem:[#allocation2 + $0x18] sm:$0xff] %v617_v51 }
 0x177   : > { %624 = vst [vmem:[#allocation2 + $0x10] sm:$0xff] %v616_v52  ;;  %1805 = vmatprep.mubr.bf16.mxu1 %v616_v52 }
 0x178   : > { %1806 = vmatmul.mubr.bf16.gmra.mrb[4].mxu1 %v617_v51 }
 0x243   : > { %v1803_v53 = vpop.f32.mrb[0].mxu1 }
 0x244   : > { %v724_v54 = vpop.f32.mrb[1].mxu1 }
 0x245   : > { %v1804_v55 = vpop.f32.mrb[2].mxu1 }
 0x246   : > { %v756_v56 = vpack.c.bf16 %v1804_v55, %v1803_v53  ;;  %v727_v57 = vpop.f32.mrb[3].mxu1 }
 0x247   : > { %v755_v58 = vpack.c.bf16 %v727_v57, %v724_v54 }
 0x248   : > { %762 = vst [vmem:[#allocation3 + $0x8] sm:$0xff] %v756_v56 }
 0x249   : > { %761 = vst [vmem:[#allocation3] sm:$0xff] %v755_v58 }
 0x24b   : > { %v1807_v59 = vpop.f32.mrb[4].mxu1 }
 0x24c   : > { %v740_v60 = vpop.f32.mrb[5].mxu1 }
 0x24d   : > { %v1808_v61 = vpop.f32.mrb[6].mxu1 }
 0x24e   : > { %v758_v62 = vpack.c.bf16 %v1808_v61, %v1807_v59  ;;  %v743_v63 = vpop.f32.mrb[7].mxu1 }
 0x24f   : > { %v757_v8 = vpack.c.bf16 %v743_v63, %v740_v60 }
 0x250   : > { %764 = vst [vmem:[#allocation3 + $0x18] sm:$0xff] %v758_v62 }
 0x251   : > { %763 = vst [vmem:[#allocation3 + $0x10] sm:$0xff] %v757_v8 }
 0x252 PF: > { %p1652_p2 = scmp.ne.s32.totalorder %s2240_s21, 1 }
 0x253   : > { %v769_v9 = vld [vmem:[#allocation3] sm:$0xff] (!%p1652_p2)  ;;  %v770_v10 = vld [vmem:[#allocation3 + $0x8] sm:$0xff] (!%p1652_p2)  ;;  %v1654_v11 = vcombine.low (!%p1652_p2), %v2480_v0, %v2482_v1  ;;  %vm800_vm1 = vcmask (!%p1652_p2), 523264   ;;  %v2014_v15 = vld [vmem:[#allocation7 + $0x10] sm:$0xff] (!%p1652_p2)   ;;  %vm1071_vm2 = vcmask (!%p1652_p2), 1043456   ;;  %v1655_v18 = vcombine.low (!%p1652_p2), %v2484_v2, %v2486_v3  ;;  %s2659_s27 = sld [smem:[#allocation20_spill]] (!%p1652_p2) }
 0x254   : > { %768 = sbr.rel (%p1652_p2) target bundleno = 1601 (0x641), region = 92  ;;  %1809 = vmatprep.subr.bf16.mxu0 (!%p1652_p2), %v769_v9  ;;  %v2012_v12 = vld [vmem:[#allocation7] sm:$0xff] (!%p1652_p2)   ;;  %v2013_v13 = vld [vmem:[#allocation7 + $0x8] sm:$0xff] (!%p1652_p2)   ;;  %v2015_v0 = vld [vmem:[#allocation7 + $0x18] sm:$0xff] (!%p1652_p2)   ;;  %v1656_v19 = vcombine.low (!%p1652_p2), %v2488_v4, %v2490_v5  ;;  %vm1058_vm3 = vcmask (!%p1652_p2), 64512   ;;  %v1657_v3 = vcombine.low (!%p1652_p2), %v2492_v6, %v2494_v7 }
 0x255   : > { %1810 = vmatpush3.bf16.msra.mxu0 (!%p1652_p2), %v769_v9  ;;  %1817 = vmatprep.mubr.msk.bf16.mxu0 (!%p1652_p2), %vm800_vm1, %v1654_v11  ;;  %v904_v17 = vld [vmem:[#allocation2] sm:$0xff] (!%p1652_p2)  ;;  %v2017_v22 = vld [vmem:[#allocation7 + $0x28] sm:$0xff] (!%p1652_p2)   ;;  %v2018_v23 = vld [vmem:[#allocation7 + $0x30] sm:$0xff] (!%p1652_p2)  }
 0x256   : > { %1811 = vmatprep.subr.bf16.mxu0 (!%p1652_p2), %v770_v10  ;;  %1825 = vmatprep.subr.bf16.mxu1 (!%p1652_p2), %v2012_v12  ;;  %v908_v1 = vld [vmem:[%s2632_s6] sm:$0xf] (!%p1652_p2)  ;;  %v2019_v4 = vld [vmem:[#allocation7 + $0x38] sm:$0xff] (!%p1652_p2)   ;;  %v2021_v5 = vld [vmem:[%s2626_s0 + $0x8] sm:$0xff] (!%p1652_p2)  }
 0x257   : > { %1826 = vmatpush3.bf16.msra.mxu1 (!%p1652_p2), %v2012_v12  ;;  %v772_v16 = vld [vmem:[#allocation3 + $0x18] sm:$0xff] (!%p1652_p2)  ;;  %1841 = vmatprep.mubr.bf16.mxu1 (!%p1652_p2), %v904_v17  ;;  %v2016_v20 = vld [vmem:[#allocation7 + $0x20] sm:$0xff] (!%p1652_p2)   ;;  %v1073_v21 = vsel (!%p1652_p2), %vm1071_vm2, %v908_v1, 0  ;;  %v2027_v6 = vld [vmem:[%s2626_s0 + $0x10] sm:$0xff] (!%p1652_p2)  }
 0x258   : > { %v771_v14 = vld [vmem:[#allocation3 + $0x10] sm:$0xff] (!%p1652_p2)  ;;  %1827 = vmatprep.subr.bf16.mxu1 (!%p1652_p2), %v2013_v13  ;;  %v2020_v2 = vld [vmem:[%s2626_s0] sm:$0xff] (!%p1652_p2)   ;;  %v905_v7 = vld [vmem:[#allocation2 + $0x8] sm:$0xff] (!%p1652_p2) }
 0x259   : > { %1812 = vmatpush3.bf16.msra.mxu0 (!%p1652_p2), %v770_v10  ;;  %v2022_v24 = vld [vmem:[#allocation9] sm:$0xff] (!%p1652_p2)   ;;  %v2023_v25 = vld [vmem:[#allocation9 + $0x8] sm:$0xff] (!%p1652_p2)   ;;  %v906_v26 = vld [vmem:[#allocation2 + $0x10] sm:$0xff] (!%p1652_p2) }
 0x25a   : > { %1813 = vmatprep.subr.bf16.mxu0 (!%p1652_p2), %v771_v14  ;;  %v2024_v27 = vld [vmem:[#allocation9 + $0x10] sm:$0xff] (!%p1652_p2)   ;;  %v2025_v28 = vld [vmem:[#allocation9 + $0x18] sm:$0xff] (!%p1652_p2)   ;;  %v2026_v29 = vld [vmem:[#allocation9 + $0x20] sm:$0xff] (!%p1652_p2)  }
 0x25b   : > { %1828 = vmatpush3.bf16.msra.mxu1 %v2013_v13  ;;  %v2028_v30 = vld [vmem:[#allocation9 + $0x28] sm:$0xff]   ;;  %v2029_v31 = vld [vmem:[%s2626_s0 + $0x18] sm:$0xff]   ;;  %v2030_v33 = vld [vmem:[#allocation9 + $0x30] sm:$0xff]  }
 0x25c   : > { %1829 = vmatprep.subr.bf16.mxu1 %v2014_v15  ;;  %v907_v32 = vld [vmem:[#allocation2 + $0x18] sm:$0xff]  ;;  %v2032_v35 = vld [vmem:[#allocation10] sm:$0xff]   ;;  %v2033_v36 = vld [vmem:[#allocation10 + $0x8] sm:$0xff]  }
 0x25d   : > { %1814 = vmatpush3.bf16.msra.mxu0 %v771_v14  ;;  %v2031_v34 = vld [vmem:[#allocation9 + $0x38] sm:$0xff]   ;;  %v2034_v37 = vld [vmem:[#allocation10 + $0x10] sm:$0xff]   ;;  %v2036_v39 = vld [vmem:[#allocation10 + $0x20] sm:$0xff]  }
 0x25e   : > { %1815 = vmatprep.subr.bf16.mxu0 %v772_v16  ;;  %v2035_v38 = vld [vmem:[#allocation10 + $0x18] sm:$0xff]   ;;  %v1653_v40 = vld [vmem:[%s2631_s5] ss:$0 sm:$0xff] }
 0x25f   : > { %1830 = vmatpush3.bf16.msra.mxu1 %v2014_v15 }
 0x260   : > { %1831 = vmatprep.subr.bf16.mxu1 %v2015_v0 }
 0x261   : > { %1816 = vmatpush3.bf16.msra.mxu0 %v772_v16 }
 0x262   : > { %1923 = vmatprep.subr.msk.bf16.mxu0 %vm1071_vm2, %v908_v1 }
 0x263   : > { %1832 = vmatpush3.bf16.msra.mxu1 %v2015_v0 }
 0x264   : > { %1818 = vmatmul.mubr.msk.bf16.vlgmr.msra.gmra.mrb[0].mxu0 %vm800_vm1, %v1655_v18  ;;  %1833 = vmatprep.subr.bf16.mxu1 %v2016_v20 }
 0x265   : > { %1821 = vmatprep.mubr.msk.bf16.mxu0 %vm800_vm1, %v1656_v19  ;;  %1850 = vmatpush3.bf16.msra.mxu0 %v1073_v21 }
 0x266   : > { %1883 = vmatprep.subr.bf16.mxu0 %v2032_v35 }
 0x267   : > { %1834 = vmatpush3.bf16.msra.mxu1 %v2016_v20 }
 0x268   : > { %1835 = vmatprep.subr.bf16.mxu1 %v2017_v22 }
 0x26b   : > { %1836 = vmatpush3.bf16.msra.mxu1 %v2017_v22 }
 0x26c   : > { %1822 = vmatmul.mubr.msk.bf16.gmra.mrb[4].mxu0 %vm800_vm1, %v1657_v3  ;;  %1837 = vmatprep.subr.bf16.mxu1 %v2018_v23 }
 0x26d   : > { %1851 = vmatprep.mubr.msk.bf16.mxu0 %vm1058_vm3, %v2020_v2 }
 0x26f   : > { %1838 = vmatpush3.bf16.msra.mxu1 %v2018_v23 }
 0x270   : > { %1839 = vmatprep.subr.bf16.mxu1 %v2019_v4 }
 0x273   : > { %1840 = vmatpush3.bf16.msra.mxu1 %v2019_v4 }
 0x274   : > { %1852 = vmatmul.mubr.msk.bf16.vlgmr.msra.gmra.mrb[8].mxu0 %vm1058_vm3, %v2021_v5  ;;  %1859 = vmatprep.subr.bf16.mxu1 %v2022_v24 }
 0x275   : > { %1855 = vmatprep.mubr.msk.bf16.mxu0 %vm1058_vm3, %v2027_v6  ;;  %1884 = vmatpush3.bf16.msra.mxu0 %v2032_v35 }
 0x276   : > { %1842 = vmatmul.mubr.bf16.vlgmr.msra.gmra.mrb[0].mxu1 %v905_v7  ;;  %1885 = vmatprep.subr.bf16.mxu0 %v2033_v36 }
 0x277   : > { %1860 = vmatpush3.bf16.msra.mxu1 %v2022_v24  ;;  %1845 = vmatprep.mubr.bf16.mxu1 %v906_v26 }
 0x278   : > { %1861 = vmatprep.subr.bf16.mxu1 %v2023_v25 }
 0x279   : > { %1886 = vmatpush3.bf16.msra.mxu0 %v2033_v36 }
 0x27a   : > { %1887 = vmatprep.subr.bf16.mxu0 %v2034_v37 }
 0x27b   : > { %1862 = vmatpush3.bf16.msra.mxu1 %v2023_v25 }
 0x27c   : > { %1863 = vmatprep.subr.bf16.mxu1 %v2024_v27  ;;  %1856 = vmatmul.mubr.msk.bf16.gmra.mrb[12].mxu0 %vm1058_vm3, %v2029_v31  ;;  %v2039_v31 = vld [vmem:[#allocation10 + $0x38] sm:$0xff]  }
 0x27d   : > { %1888 = vmatpush3.bf16.msra.mxu0 %v2034_v37 }
 0x27e   : > { %1846 = vmatmul.mubr.bf16.gmra.mrb[4].mxu1 %v907_v32  ;;  %1889 = vmatprep.subr.bf16.mxu0 %v2035_v38 }
 0x27f   : > { %1864 = vmatpush3.bf16.msra.mxu1 %v2024_v27 }
 0x280   : > { %1865 = vmatprep.subr.bf16.mxu1 %v2025_v28 }
 0x281   : > { %1890 = vmatpush3.bf16.msra.mxu0 %v2035_v38 }
 0x282   : > { %1891 = vmatprep.subr.bf16.mxu0 %v2036_v39 }
 0x283   : > { %1866 = vmatpush3.bf16.msra.mxu1 %v2025_v28 }
 0x284   : > { %1867 = vmatprep.subr.bf16.mxu1 %v2026_v29 }
 0x285   : > { %1892 = vmatpush3.bf16.msra.mxu0 %v2036_v39 }
 0x287   : > { %1868 = vmatpush3.bf16.msra.mxu1 %v2026_v29  ;;  %v2037_v29 = vld [vmem:[#allocation10 + $0x28] sm:$0xff]  }
 0x288   : > { %1869 = vmatprep.subr.bf16.mxu1 %v2028_v30  ;;  %1893 = vmatprep.subr.bf16.mxu0 %v2037_v29 }
 0x289   : > { %1894 = vmatpush3.bf16.msra.mxu0 %v2037_v29 }
 0x28b   : > { %1870 = vmatpush3.bf16.msra.mxu1 %v2028_v30  ;;  %v2038_v30 = vld [vmem:[#allocation10 + $0x30] sm:$0xff]  }
 0x28c   : > { %1871 = vmatprep.subr.bf16.mxu1 %v2030_v33  ;;  %1895 = vmatprep.subr.bf16.mxu0 %v2038_v30 }
 0x28d   : > { %1896 = vmatpush3.bf16.msra.mxu0 %v2038_v30 }
 0x28e   : > { %1897 = vmatprep.subr.bf16.mxu0 %v2039_v31 }
 0x28f   : > { %1872 = vmatpush3.bf16.msra.mxu1 %v2030_v33  ;;  %v1686_v33 = vld [vmem:[%s2635_s9] ss:$0 sm:$0xff] }
 0x290   : > { %1873 = vmatprep.subr.bf16.mxu1 %v2031_v34 }
 0x291   : > { %1898 = vmatpush3.bf16.msra.mxu0 %v2039_v31 }
 0x293   : > { %1874 = vmatpush3.bf16.msra.mxu1 %v2031_v34 }
 0x337   : > { %v1819_v41 = vpop.f32.mrb[0].mxu0 }
 0x338   : > { %v856_v42 = vadd.f32 %v1819_v41, %v1653_v40  ;;  %v847_v43 = vpop.f32.mrb[1].mxu0 }
 0x339   : > { %v848_v44 = vadd.f32 %v1653_v40, %v847_v43  ;;  %v1820_v45 = vpop.f32.mrb[2].mxu0 }
 0x33a   : > { %v859_v46 = vadd.f32 %v1820_v45, %v1653_v40  ;;  %v850_v47 = vpop.f32.mrb[3].mxu0  ;;  %v880_v49 = vmax.f32 %v856_v42, 0.0 }
 0x33b   : > { %v851_v48 = vadd.f32 %v1653_v40, %v850_v47  ;;  %v878_v51 = vmax.f32 %v848_v44, 0.0 }
 0x33c   : > { %v881_v50 = vmax.f32 %v859_v46, 0.0 }
 0x33d   : > { %v879_v52 = vmax.f32 %v851_v48, 0.0 }
 0x33e   : > { %v887_v53 = vpack.c.bf16 %v881_v50, %v880_v49 }
 0x33f   : > { %v886_v54 = vpack.c.bf16 %v879_v52, %v878_v51  ;;  %v1823_v55 = vpop.f32.mrb[4].mxu0 }
 0x340   : > { %v872_v56 = vadd.f32 %v1823_v55, %v1653_v40  ;;  %v863_v57 = vpop.f32.mrb[5].mxu0 }
 0x341   : > { %v864_v58 = vadd.f32 %v1653_v40, %v863_v57  ;;  %v1824_v59 = vpop.f32.mrb[6].mxu0  ;;  %1875 = vmatprep.mubr.bf16.mxu1 %v886_v54 }
 0x342   : > { %v884_v60 = vmax.f32 %v872_v56, 0.0  ;;  %v875_v61 = vadd.f32 %v1824_v59, %v1653_v40  ;;  %v866_v62 = vpop.f32.mrb[7].mxu0  ;;  %1876 = vmatmul.mubr.bf16.vlgmr.msra.gmra.mrb[8].mxu1 %v887_v53 }
 0x343   : > { %v867_v63 = vadd.f32 %v1653_v40, %v866_v62  ;;  %v882_v9 = vmax.f32 %v864_v58, 0.0 }
 0x344   : > { %v885_v8 = vmax.f32 %v875_v61, 0.0 }
 0x345   : > { %v883_v10 = vmax.f32 %v867_v63, 0.0 }
 0x346   : > { %v889_v11 = vpack.c.bf16 %v885_v8, %v884_v60 }
 0x347   : > { %v888_v12 = vpack.c.bf16 %v883_v10, %v882_v9  ;;  %v1853_v13 = vpop.f32.mrb[8].mxu0 }
 0x348   : > { %v1109_v14 = vpop.f32.mrb[9].mxu0 }
 0x349   : > { %1879 = vmatprep.mubr.bf16.mxu1 %v888_v12  ;;  %v1854_v15 = vpop.f32.mrb[10].mxu0  ;;  %v1843_v16 = vpop.f32.mrb[0].mxu1 }
 0x34a   : > { %1880 = vmatmul.mubr.bf16.gmra.mrb[12].mxu1 %v889_v11  ;;  %v1112_v17 = vpop.f32.mrb[11].mxu0  ;;  %v1118_v0 = vadd.f32 %v1853_v13, %v1843_v16  ;;  %v1007_v1 = vpop.f32.mrb[1].mxu1  ;;  %v1687_v13 = vld [vmem:[%s2659_s27] ss:$0 sm:$0xff] }
 0x34b   : > { %v1110_v18 = vadd.f32 %v1109_v14, %v1007_v1  ;;  %v1844_v19 = vpop.f32.mrb[2].mxu1 }
 0x34c   : > { %v1121_v20 = vadd.f32 %v1854_v15, %v1844_v19  ;;  %v1010_v21 = vpop.f32.mrb[3].mxu1 }
 0x34d   : > { %v1113_v22 = vadd.f32 %v1112_v17, %v1010_v21 }
 0x34f   : > { %v1857_v2 = vpop.f32.mrb[12].mxu0 }
 0x350   : > { %v1125_v5 = vpop.f32.mrb[13].mxu0 }
 0x351   : > { %v1847_v23 = vpop.f32.mrb[4].mxu1  ;;  %v1858_v7 = vpop.f32.mrb[14].mxu0 }
 0x352   : > { %v1134_v3 = vadd.f32 %v1857_v2, %v1847_v23  ;;  %v1023_v4 = vpop.f32.mrb[5].mxu1  ;;  %v1128_v27 = vpop.f32.mrb[15].mxu0 }
 0x353   : > { %v1126_v24 = vadd.f32 %v1125_v5, %v1023_v4  ;;  %v1848_v6 = vpop.f32.mrb[6].mxu1 }
 0x354   : > { %v1137_v25 = vadd.f32 %v1858_v7, %v1848_v6  ;;  %v1026_v26 = vpop.f32.mrb[7].mxu1 }
 0x355   : > { %v1129_v28 = vadd.f32 %v1128_v27, %v1026_v26 }
 0x415   : > { %v1877_v32 = vpop.f32.mrb[8].mxu1 }
 0x416   : > { %v1271_v34 = vadd.f32 %v1877_v32, %v1118_v0  ;;  %v1238_v35 = vpop.f32.mrb[9].mxu1 }
 0x417   : > { %v1269_v36 = vadd.f32 %v1238_v35, %v1110_v18  ;;  %v1878_v37 = vpop.f32.mrb[10].mxu1 }
 0x418   : > { %v1286_v38 = vadd.f32 %v1686_v33, %v1271_v34  ;;  %v1272_v39 = vadd.f32 %v1878_v37, %v1121_v20  ;;  %v1241_v40 = vpop.f32.mrb[11].mxu1 }
 0x419   : > { %v1284_v41 = vadd.f32 %v1686_v33, %v1269_v36  ;;  %v1270_v42 = vadd.f32 %v1241_v40, %v1113_v22 }
 0x41a   : > { %v1287_v43 = vadd.f32 %v1686_v33, %v1272_v39  ;;  %v1294_v45 = vmax.f32 %v1286_v38, 0.0 }
 0x41b   : > { %v1285_v44 = vadd.f32 %v1686_v33, %v1270_v42  ;;  %v1292_v47 = vmax.f32 %v1284_v41, 0.0 }
 0x41c   : > { %v1295_v46 = vmax.f32 %v1287_v43, 0.0 }
 0x41d   : > { %v1293_v48 = vmax.f32 %v1285_v44, 0.0  ;;  %v1881_v49 = vpop.f32.mrb[12].mxu1 }
 0x41e   : > { %v1301_v50 = vpack.c.bf16 %v1295_v46, %v1294_v45  ;;  %v1275_v51 = vadd.f32 %v1881_v49, %v1134_v3  ;;  %v1254_v52 = vpop.f32.mrb[13].mxu1 }
 0x41f   : > { %v1273_v53 = vadd.f32 %v1254_v52, %v1126_v24  ;;  %v1882_v54 = vpop.f32.mrb[14].mxu1  ;;  %v1300_v55 = vpack.c.bf16 %v1293_v48, %v1292_v47 }
 0x420   : > { %v1290_v56 = vadd.f32 %v1686_v33, %v1275_v51  ;;  %v1276_v57 = vadd.f32 %v1882_v54, %v1137_v25  ;;  %v1257_v58 = vpop.f32.mrb[15].mxu1 }
 0x421   : > { %v1288_v59 = vadd.f32 %v1686_v33, %v1273_v53  ;;  %v1274_v60 = vadd.f32 %v1257_v58, %v1129_v28  ;;  %1899 = vmatprep.mubr.bf16.mxu0 %v1300_v55 }
 0x422   : > { %v1291_v61 = vadd.f32 %v1686_v33, %v1276_v57  ;;  %1900 = vmatmul.mubr.bf16.vlgmr.msra.gmra.mrb[16].mxu0 %v1301_v50  ;;  %v1298_v63 = vmax.f32 %v1290_v56, 0.0 }
 0x423   : > { %v1289_v62 = vadd.f32 %v1686_v33, %v1274_v60  ;;  %v1296_v9 = vmax.f32 %v1288_v59, 0.0 }
 0x424   : > { %v1299_v8 = vmax.f32 %v1291_v61, 0.0 }
 0x425   : > { %v1297_v10 = vmax.f32 %v1289_v62, 0.0 }
 0x426   : > { %v1303_v11 = vpack.c.bf16 %v1299_v8, %v1298_v63 }
 0x427   : > { %v1302_v12 = vpack.c.bf16 %v1297_v10, %v1296_v9 }
 0x429   : > { %1903 = vmatprep.mubr.bf16.mxu0 %v1302_v12 }
 0x42a   : > { %1904 = vmatmul.mubr.bf16.gmra.mrb[20].mxu0 %v1303_v11 }
 0x4f5   : > { %v1901_v14 = vpop.f32.mrb[16].mxu0 }
 0x4f6   : > { %v1418_v15 = vadd.f32 %v1901_v14, %v1687_v13  ;;  %v1409_v16 = vpop.f32.mrb[17].mxu0 }
 0x4f7   : > { %v1410_v17 = vadd.f32 %v1687_v13, %v1409_v16  ;;  %v1902_v0 = vpop.f32.mrb[18].mxu0 }
 0x4f8   : > { %1444 = vmax.xlane.f32.xlu1 %v1418_v15  ;;  %v1412_v1 = vpop.f32.mrb[19].mxu0  ;;  %v1421_v18 = vadd.f32 %v1902_v0, %v1687_v13 }
 0x4f9   : > { %1440 = vmax.xlane.f32.xlu0 %v1410_v17  ;;  %v1413_v19 = vadd.f32 %v1687_v13, %v1412_v1 }
 0x4fc   : > { %1446 = vmax.xlane.f32.xlu1 %v1421_v18 }
 0x4fd   : > { %1442 = vmax.xlane.f32.xlu0 %v1413_v19  ;;  %v1905_v20 = vpop.f32.mrb[20].mxu0 }
 0x4fe   : > { %v1425_v21 = vpop.f32.mrb[21].mxu0  ;;  %v1434_v4 = vadd.f32 %v1905_v20, %v1687_v13 }
 0x4ff   : > { %v1426_v22 = vadd.f32 %v1687_v13, %v1425_v21  ;;  %v1906_v23 = vpop.f32.mrb[22].mxu0 }
 0x500   : > { %v1428_v2 = vpop.f32.mrb[23].mxu0  ;;  %v1437_v5 = vadd.f32 %v1906_v23, %v1687_v13 }
 0x501   : > { %v1429_v3 = vadd.f32 %v1687_v13, %v1428_v2  ;;  %1448 = vmax.xlane.f32.xlu0 %v1426_v22 }
 0x503   : > { %1450 = vmax.xlane.f32.xlu1 %v1429_v3 }
 0x505   : > { %1452 = vmax.xlane.f32.xlu0 %v1434_v4 }
 0x507   : > { %1454 = vmax.xlane.f32.xlu1 %v1437_v5 }
 0x585   : > { %v1445_v24 = vpop.xlane.xlu1 %1444 }
 0x586   : > { %v1458_v6 = vsub.f32 %v1418_v15, %v1445_v24  ;;  %v1441_v7 = vpop.xlane.xlu0 %1440 }
 0x587   : > { %v1456_v25 = vsub.f32 %v1410_v17, %v1441_v7 }
 0x588   : > { %v1468_v26 = vmul.f32 1.442695, %v1458_v6 }
 0x589   : > { %v1464_v27 = vmul.f32 1.442695, %v1456_v25  ;;  %v1447_v28 = vpop.xlane.xlu1 %1446 }
 0x58a   : > { %2040 = vpow2.f32 %v1468_v26  ;;  %v1459_v29 = vsub.f32 %v1421_v18, %v1447_v28  ;;  %v1443_v30 = vpop.xlane.xlu0 %1442 }
 0x58b   : > { %v1457_v31 = vsub.f32 %v1413_v19, %v1443_v30  ;;  %2042 = vpow2.f32 %v1464_v27 }
 0x58c   : > { %v1470_v32 = vmul.f32 1.442695, %v1459_v29 }
 0x58d   : > { %v1466_v33 = vmul.f32 1.442695, %v1457_v31 }
 0x58e   : > { %2044 = vpow2.f32 %v1470_v32  ;;  %v1449_v34 = vpop.xlane.xlu0 %1448 }
 0x58f   : > { %v1460_v35 = vsub.f32 %v1426_v22, %v1449_v34  ;;  %2046 = vpow2.f32 %v1466_v33 }
 0x590   : > { %v1451_v36 = vpop.xlane.xlu1 %1450 }
 0x591   : > { %v1472_v37 = vmul.f32 1.442695, %v1460_v35  ;;  %v1461_v38 = vsub.f32 %v1429_v3, %v1451_v36 }
 0x592   : > { %v1453_v39 = vpop.xlane.xlu0 %1452 }
 0x593   : > { %2048 = vpow2.f32 %v1472_v37  ;;  %v1474_v40 = vmul.f32 1.442695, %v1461_v38  ;;  %v1462_v41 = vsub.f32 %v1434_v4, %v1453_v39 }
 0x594   : > { %v2041_v42 = vpop.eup %2040  ;;  %v1455_v43 = vpop.xlane.xlu1 %1454 }
 0x595   : > { %2050 = vpow2.f32 %v1474_v40  ;;  %v1476_v44 = vmul.f32 1.442695, %v1462_v41  ;;  %v1463_v45 = vsub.f32 %v1437_v5, %v1455_v43  ;;  %1484 = vadd.xlane.f32.xlu0 %v2041_v42  ;;  %v2043_v46 = vpop.eup %2042 }
 0x597   : > { %2052 = vpow2.f32 %v1476_v44  ;;  %v1478_v47 = vmul.f32 1.442695, %v1463_v45 }
 0x598   : > { %v2045_v48 = vpop.eup %2044 }
 0x599   : > { %2054 = vpow2.f32 %v1478_v47  ;;  %1486 = vadd.xlane.f32.xlu1 %v2045_v48  ;;  %1480 = vadd.xlane.f32.xlu0 %v2043_v46  ;;  %v2047_v49 = vpop.eup %2046 }
 0x59d   : > { %v2049_v50 = vpop.eup %2048  ;;  %1482 = vadd.xlane.f32.xlu1 %v2047_v49 }
 0x59e   : > { %1488 = vadd.xlane.f32.xlu0 %v2049_v50 }
 0x59f   : > { %v2051_v51 = vpop.eup %2050 }
 0x5a1   : > { %v2053_v52 = vpop.eup %2052  ;;  %1490 = vadd.xlane.f32.xlu1 %v2051_v51 }
 0x5a2   : > { %1492 = vadd.xlane.f32.xlu0 %v2053_v52 }
 0x5a3   : > { %v2055_v53 = vpop.eup %2054 }
 0x5a5   : > { %1494 = vadd.xlane.f32.xlu1 %v2055_v53 }
 0x622   : > { %v1485_v54 = vpop.xlane.xlu0 %1484 }
 0x623   : > { %2056 = vrcp.f32 %v1485_v54 }
 0x626   : > { %v1487_v55 = vpop.xlane.xlu1 %1486  ;;  %v1481_v56 = vpop.xlane.xlu0 %1480 }
 0x627   : > { %2058 = vrcp.f32 %v1487_v55 }
 0x628   : > { %2060 = vrcp.f32 %v1481_v56 }
 0x62a   : > { %v1483_v57 = vpop.xlane.xlu1 %1482 }
 0x62b   : > { %2062 = vrcp.f32 %v1483_v57  ;;  %v1489_v58 = vpop.xlane.xlu0 %1488 }
 0x62c   : > { %2064 = vrcp.f32 %v1489_v58 }
 0x62d   : > { %v2057_v59 = vpop.eup %2056 }
 0x62e   : > { %v1506_v60 = vmul.f32 %v2057_v59, %v2041_v42  ;;  %v1491_v61 = vpop.xlane.xlu1 %1490 }
 0x62f   : > { %2066 = vrcp.f32 %v1491_v61  ;;  %v1493_v62 = vpop.xlane.xlu0 %1492 }
 0x630   : > { %1515 = vst [vmem:[#allocation12 + $0x10] sm:$0xff] %v1506_v60  ;;  %2068 = vrcp.f32 %v1493_v62 }
 0x631   : > { %v2059_v63 = vpop.eup %2058 }
 0x632   : > { %v2061_v8 = vpop.eup %2060  ;;  %v1507_v9 = vmul.f32 %v2059_v63, %v2045_v48  ;;  %v1495_v10 = vpop.xlane.xlu1 %1494 }
 0x633   : > { %v1504_v11 = vmul.f32 %v2061_v8, %v2043_v46  ;;  %2070 = vrcp.f32 %v1495_v10 }
 0x634   : > { %1516 = vst [vmem:[#allocation12 + $0x18] sm:$0xff] %v1507_v9 }
 0x635   : > { %v2063_v12 = vpop.eup %2062  ;;  %1513 = vst [vmem:[#allocation12] sm:$0xff] %v1504_v11 }
 0x636   : > { %v2065_v13 = vpop.eup %2064  ;;  %v1505_v14 = vmul.f32 %v2063_v12, %v2047_v49 }
 0x637   : > { %v1508_v15 = vmul.f32 %v2065_v13, %v2049_v50 }
 0x638   : > { %1514 = vst [vmem:[#allocation12 + $0x8] sm:$0xff] %v1505_v14 }
 0x639   : > { %v2067_v16 = vpop.eup %2066  ;;  %1517 = vst [vmem:[#allocation12 + $0x20] sm:$0xff] %v1508_v15 }
 0x63a   : > { %v2069_v17 = vpop.eup %2068  ;;  %v1509_v0 = vmul.f32 %v2067_v16, %v2051_v51 }
 0x63b   : > { %v1510_v1 = vmul.f32 %v2069_v17, %v2053_v52 }
 0x63c   : > { %1518 = vst [vmem:[#allocation12 + $0x28] sm:$0xff] %v1509_v0 }
 0x63d   : > { %v2071_v18 = vpop.eup %2070  ;;  %1519 = vst [vmem:[#allocation12 + $0x30] sm:$0xff] %v1510_v1 }
 0x63e   : > { %v1511_v19 = vmul.f32 %v2071_v18, %v2055_v53 }
 0x640   : > { %1520 = vst [vmem:[#allocation12 + $0x38] sm:$0xff] %v1511_v19 }
 0x641 PF: > { %s2660_s16 = sld [smem:[#allocation18_spill]]  ;;  %s2256_s21 = smov [#allocation12]  }
 0x642   : > { %s1527_s7 = sshll.u32 %s2256_s21, 4  ;;  %s1528_s7 = int_to_ptr.vmem [resolvable:$true] %s1527_s7 }
 0x643   : > { %s2184_s12 = scalar_lea.vmem %s1528_s7, 1024  ;;  %p2191_p6 = scmp.lt.s32.totalorder %s1528_s7, %s1528_s7 }
 0x644   : > { %p2185_p11 = scmp.ne.s32.totalorder %s1528_s7, %s2184_s12  ;;  %p2192_p0 = scmp.lt.s32.totalorder %s2184_s12, %s2184_s12 }
 0x646   : > { %p2193_p1 = por %p2192_p0, %p2191_p6 }
 0x647   : > { %s2661_s22 = sadd.s32 4294967295, %s2660_s16  }
 0x648   : > { %p2591_p10 = scmp.eq.s32.totalorder %s2661_s22, 1 }
 0x64a   : > { %p2186_p12 = pnand %p2185_p11, %p2591_p10 }
 0x64c   : > { %p2187_p13 = pneg %p2186_p12 }
 0x64e   : > { %p2194_p4 = pnand %p2193_p1, %p2187_p13 }
 0x650   : > { %2197 = shalt.err (!%p2194_p4)
}
 0x651   : > { %s2663_s18 = sld [smem:[#allocation21_spill]] }
 0x657   : > { %s2198_s19 = scalar_lea.hbm %s2663_s18, 1024 }
 0x658   : > { %p2199_p7 = scmp.ne.s32.totalorder %s2663_s18, %s2198_s19  ;;  %p2204_p8 = scmp.lt.u32.totalorder %s2198_s19, %s2663_s18 }
 0x65a   : > { %p2200_p9 = pnand %p2199_p7, %p2591_p10 }
 0x65c   : > { %p2201_p3 = pneg %p2200_p9 }
 0x65e   : > { %p2206_p5 = pnand %p2204_p8, %p2201_p3 }
 0x660   : > { %2209 = shalt.err (!%p2206_p5)
}
 0x661   : > { %s2257_s13 = smov 128   ;;  %s2258_s15 = smov 8  }
 0x662   : > { %1941 = dma.vmem_to_hbm [thread:$0]  (%p2591_p10), %s1528_s7, 1024, %s2663_s18, [#allocation6], %s2257_s13, %s2257_s13, %s2258_s15  }
 0x663   : > { %2235 = dma.done.wait (%p2591_p10), [#allocation6], 1024  }
 0x664   : > { %2237 = vsyncadd (%p2591_p10), [#allocation6], 4294966272 }
 0x665 PF: > { %s2664_s29 = sld [smem:[#allocation18_spill]]  ;;  %s2665_s21 = sld [smem:[#allocation17_spill]] }
 0x666   : > { %s2666_s22 = smov %s2668_s30 }
 0x66b   : > { %s26_s23 = sadd.s32 1, %s2664_s29  }
 0x66c   : > { %p23_p2 = scmp.ge.s32.totalorder %s26_s23, 4  }
 0x66e   :  { %25 = sbr.rel (!%p23_p2) target bundleno = 9 (0x9), region = 123 }
 0x675   :  { %1543 = vsyncpa [#allocation5], 1 }
 0x676   :  { %1545 = vsyncpa [#allocation5 + $0x1], 1 }
 0x677   :  { %1546 = vsyncpa [#allocation8], 1 }
 0x678   :  { %1547 = vsyncpa [#allocation11], 1 }
 0x679   :  { %1548 = vsyncpa [#allocation6], 1 }
 0x67a   :  { %1550 = vsyncpa [#allocation6 + $0x1], 1 }

</bundles_post_ra>
